<compile_context>
chip_gen: v5e
topology: v5e:2x2
jax: 0.10.0
libtpu: 0.0.40
codegen_flags: <defaults>
</compile_context>

<pallas_src>
import functools

import jax
import jax.numpy as jnp
from jax.experimental import pallas as pl
from jax.experimental.pallas import tpu as pltpu

_LANE = 128      # TPU lane width (last dim)
_SUBLANE = 8     # f32 sublane tile (second-to-last dim)


# ----------------------------------------------------------------------------
# Init-time glue (mirrors Activation.__init__): parity check + normalize2mom
# ----------------------------------------------------------------------------
def _normalize2mom_const(act, key, n=1_000_000):
    """e3nn normalize2mom: scale so act(z), z~N(0,1), has unit second moment."""
    z = jax.random.normal(key, (n,), dtype=jnp.float32)
    c = float(1.0 / jnp.sqrt(jnp.mean(act(z) ** 2)))
    if abs(c - 1.0) < 1e-4:
        c = 1.0
    return c


def _act_parity(act):
    """+1 even, -1 odd, 0 neither (matches the torch.linspace(0,10,256) probe)."""
    x = jnp.linspace(0.0, 10.0, 256, dtype=jnp.float32)
    a1, a2 = act(x), act(-x)
    if float(jnp.max(jnp.abs(a1 - a2))) < 1e-5:
        return 1
    if float(jnp.max(jnp.abs(a1 + a2))) < 1e-5:
        return -1
    return 0


def build_activation(irreps_in, acts, key):
    """irreps_in: list of (mul, (l, p)).  acts: list of callables or None.

    Returns (segments, irreps_out, total_dim). `segments` is a static list of
    (start, width, act_or_None, norm_const) describing the channel layout.
    """
    if len(irreps_in) != len(acts):
        raise ValueError("Irreps in and number of activation functions does not match")

    segments = []
    irreps_out = []
    index = 0
    keys = jax.random.split(key, max(len(acts), 1))
    for i, ((mul, (l_in, p_in)), act) in enumerate(zip(irreps_in, acts)):
        ir_dim = 2 * l_in + 1
        if act is not None:
            if l_in != 0:
                raise ValueError("Activation: cannot apply an activation to a non-scalar input.")
            p_act = _act_parity(act)
            p_out = p_act if p_in == -1 else p_in
            if p_out == 0:
                raise ValueError("Activation: the parity is violated!")
            irreps_out.append((mul, (0, p_out)))
            cst = _normalize2mom_const(act, keys[i])
            segments.append((index, mul, act, cst))
            index += mul
        else:
            irreps_out.append((mul, (l_in, p_in)))
            width = mul * ir_dim
            segments.append((index, width, None, 1.0))
            index += width
    return segments, irreps_out, index


# ----------------------------------------------------------------------------
# Pallas kernel: full-tile compute, masked-select blend, ONE full-width store
# ----------------------------------------------------------------------------
def _activation_kernel(x_ref, o_ref, *, segments, d_total):
    x = x_ref[...]
    xf = x.astype(jnp.float32)                                   # f32 compute path
    col = jax.lax.broadcasted_iota(jnp.int32, xf.shape, dimension=1)

    out = xf                                                     # passthrough default
    for (start, width, act, cst) in segments:                    # static, unrolled
        if act is None:
            continue
        # 128-lane-aligned superset of this segment's columns (static slice ->
        # vreg-boundary slicing, no lane shuffles; bounds EUP work for large D).
        a = (start // _LANE) * _LANE
        b = min(-(-(start + width) // _LANE) * _LANE, d_total)
        y = act(xf[:, a:b]) * jnp.asarray(cst, jnp.float32)
        m = (col[:, a:b] >= start) & (col[:, a:b] < start + width)
        blended = jnp.where(m, y, out[:, a:b])
        if a == 0 and b == d_total:
            out = blended
        else:
            out = jax.lax.dynamic_update_slice(out, blended, (0, a))

    o_ref[...] = out.astype(o_ref.dtype)                         # single lane-dense store


def activation_forward(features, segments, d_total, *, block_rows=1024,
                       vmem_limit_bytes=32 * 1024 * 1024):
    """features: (..., D) with D = sum of irreps widths.  Applies Activation."""
    orig_shape = features.shape
    D = orig_shape[-1]
    assert D == d_total, f"feature dim {D} != irreps dim {d_total}"

    if not segments:  # matches torch: empty irreps -> zeros_like
        return jnp.zeros_like(features)

    x2d = features.reshape(-1, D)
    N = x2d.shape[0]

    # Row-tile choice: multiple of the f32 sublane tile (8), no bigger than the
    # (rounded-up) row count, and VMEM-safe on all generations -- Pallas
    # double-buffers input and output blocks (~4x tile bytes), so keep a single
    # tile <= ~4 MiB (well under v7x's 64 MiB VMEM even with headroom).
    itemsize = jnp.dtype(features.dtype).itemsize
    max_rows_vmem = max(_SUBLANE, (4 * 1024 * 1024) // max(D * itemsize, 1))
    max_rows_vmem = (max_rows_vmem // _SUBLANE) * _SUBLANE
    rows_needed = -(-N // _SUBLANE) * _SUBLANE
    br = min(block_rows, max_rows_vmem, max(rows_needed, _SUBLANE))
    br = max(_SUBLANE, (br // _SUBLANE) * _SUBLANE)

    kernel = functools.partial(_activation_kernel, segments=segments, d_total=D)
    out2d = pl.pallas_call(
        kernel,
        out_shape=jax.ShapeDtypeStruct((N, D), features.dtype),
        grid=(pl.cdiv(N, br),),
        in_specs=[pl.BlockSpec((br, D), lambda i: (i, 0))],
        out_specs=pl.BlockSpec((br, D), lambda i: (i, 0)),
        compiler_params=pltpu.CompilerParams(
            dimension_semantics=("parallel",),      # row axis shards across TCs (v7x)
            vmem_limit_bytes=vmem_limit_bytes,      # raise v5e's 16 MiB scoped default
        ),
    )(x2d)
    return out2d.reshape(orig_shape)

# TODO(synk): if the activated (l=0) channels form a contiguous prefix and D is
# large, skip re-streaming passthrough channels via input_output_aliases and a
# column-restricted BlockSpec (further ~D/D_act traffic cut on mem-bound path).


# ----------------------------------------------------------------------------
# Demo / self-test
# ----------------------------------------------------------------------------
if __name__ == "__main__":
    # irreps_in = "16x0e + 8x0o + 16x1o", acts = [silu, tanh, None]
    # -> SiLU on the 16 even scalars, tanh (odd) on the 8 odd scalars,
    #    passthrough on the 16 vector (l=1) irreps (48 channels).
    irreps_in = [(16, (0, 1)), (8, (0, -1)), (16, (1, -1))]
    acts = [jax.nn.silu, jnp.tanh, None]

    segments, irreps_out, total_dim = build_activation(
        irreps_in, acts, key=jax.random.PRNGKey(42)
    )
    assert total_dim == 16 + 8 + 48  # = 72

    n_nodes = 200  # small; also exercises a partial row tile
    features = jax.random.normal(
        jax.random.PRNGKey(0), (n_nodes, total_dim), dtype=jnp.float32
    )

    out = jax.block_until_ready(activation_forward(features, segments, total_dim))

    # Pure-JAX reference for correctness (per-segment narrow + concat, like torch).
    ref_parts = []
    for (start, width, act, cst) in segments:
        seg = features[:, start:start + width].astype(jnp.float32)
        if act is not None:
            seg = act(seg) * cst
        ref_parts.append(seg.astype(features.dtype))
    ref = jnp.concatenate(ref_parts, axis=-1)

    assert out.shape == features.shape
    assert float(jnp.max(jnp.abs(out - ref))) < 1e-5

    print("KERNEL_OK")
</pallas_src>

<mosaic_0001>
module attributes {stable_mosaic.version = 11 : i64} {
  func.func @_activation_kernel(%arg0: i32, %arg1: memref<200x72xf32, #tpu.memory_space<vmem>>, %arg2: memref<200x72xf32, #tpu.memory_space<vmem>>) attributes {dimension_semantics = [#tpu.dimension_semantics<parallel>], iteration_bounds = array<i64: 1>, scalar_prefetch = 0 : i64, scratch_operands = 0 : i64, tpu.core_type = #tpu.core_type<tc>, window_params = [{transform_indices = @transform_0, window_bounds = array<i64: 200, 72>}, {transform_indices = @transform_1, window_bounds = array<i64: 200, 72>}]} {
    %c0 = arith.constant 0 : index
    %c0_0 = arith.constant 0 : index
    %0 = vector.load %arg1[%c0, %c0_0] : memref<200x72xf32, #tpu.memory_space<vmem>>, vector<200x72xf32>
    %1 = tpu.iota {dimensions = array<i32: 1>} : vector<200x72xi32>
    %2 = arith.negf %0 : vector<200x72xf32>
    %3 = math.exp %2 : vector<200x72xf32>
    %cst = arith.constant 1.000000e+00 : f32
    %4 = vector.broadcast %cst : f32 to vector<200x72xf32>
    %5 = arith.addf %4, %3 : vector<200x72xf32>
    %6 = arith.divf %4, %5 : vector<200x72xf32>
    %7 = arith.mulf %0, %6 : vector<200x72xf32>
    %cst_1 = arith.constant 1.67724967 : f32
    %8 = vector.broadcast %cst_1 : f32 to vector<200x72xf32>
    %9 = arith.mulf %7, %8 : vector<200x72xf32>
    %c0_i32 = arith.constant 0 : i32
    %10 = vector.broadcast %c0_i32 : i32 to vector<200x72xi32>
    %11 = arith.cmpi sge, %1, %10 : vector<200x72xi32>
    %c16_i32 = arith.constant 16 : i32
    %12 = vector.broadcast %c16_i32 : i32 to vector<200x72xi32>
    %13 = arith.cmpi slt, %1, %12 : vector<200x72xi32>
    %14 = arith.andi %11, %13 : vector<200x72xi1>
    %15 = arith.select %14, %9, %0 : vector<200x72xi1>, vector<200x72xf32>
    %16 = math.tanh %0 : vector<200x72xf32>
    %cst_2 = arith.constant 1.59251535 : f32
    %17 = vector.broadcast %cst_2 : f32 to vector<200x72xf32>
    %18 = arith.mulf %16, %17 : vector<200x72xf32>
    %c16_i32_3 = arith.constant 16 : i32
    %19 = vector.broadcast %c16_i32_3 : i32 to vector<200x72xi32>
    %20 = arith.cmpi sge, %1, %19 : vector<200x72xi32>
    %c24_i32 = arith.constant 24 : i32
    %21 = vector.broadcast %c24_i32 : i32 to vector<200x72xi32>
    %22 = arith.cmpi slt, %1, %21 : vector<200x72xi32>
    %23 = arith.andi %20, %22 : vector<200x72xi1>
    %24 = arith.select %23, %18, %15 : vector<200x72xi1>, vector<200x72xf32>
    %c0_4 = arith.constant 0 : index
    %c0_5 = arith.constant 0 : index
    %25 = vector.load %arg2[%c0_4, %c0_5] : memref<200x72xf32, #tpu.memory_space<vmem>>, vector<200x72xf32>
    tpu.vector_store %arg2[%c0_4, %c0_5], %24 {strides = array<i32>} : memref<200x72xf32, #tpu.memory_space<vmem>>, vector<200x72xf32>,
    return
  }
  func.func @transform_0(%arg0: i32) -> (i32, i32) {
    %c0_i32 = arith.constant 0 : i32
    %c0_i32_0 = arith.constant 0 : i32
    return %arg0, %c0_i32 : i32, i32
  }
  func.func @transform_1(%arg0: i32) -> (i32, i32) {
    %c0_i32 = arith.constant 0 : i32
    %c0_i32_0 = arith.constant 0 : i32
    return %arg0, %c0_i32 : i32, i32
  }
}

</mosaic_0001>

<bundles_post_ra>
// kernel: tpu_custom_call.1
= control target key start
LH: loop header
LB: loop body
LE: loop exit
PB: predicated region body
PF: predicated region fallthrough
CT: control target
= control target key end

     0   :  { %v33_v20 = vlaneseq  ;;  %vm666_vm15 = vcmask 588800   ;;  %s1931_s0 = inlined_call_operand.vmem [shape: f32[200,72], index: 0, kind: input, shape index: {}]   ;;  %s1932_s1 = inlined_call_operand.vmem [shape: f32[200,72], index: 1, kind: output, shape index: {}]  }
   0x1   :  { %v884_v0 = vld [vmem:[%s1931_s0] sm:$0xff]  ;;  %v889_v1 = vld [vmem:[%s1931_s0 + $0x8] sm:$0xff]  ;;  %v894_v2 = vld [vmem:[%s1931_s0 + $0x10] sm:$0xff] }
   0x2   :  { %v696_v3 = vmul.f32 -1.442695, %v884_v0  ;;  %721 = vtanh.f32 %v884_v0  ;;  %v697_v4 = vmul.f32 -1.442695, %v889_v1  ;;  %v902_v5 = vld [vmem:[%s1931_s0 + $0x18] sm:$0xff]  ;;  %v909_v7 = vld [vmem:[%s1931_s0 + $0x20] sm:$0xff] }
   0x3   :  { %723 = vtanh.f32 %v889_v1  ;;  %v698_v6 = vmul.f32 -1.442695, %v894_v2  ;;  %v699_v8 = vmul.f32 -1.442695, %v902_v5  ;;  %v915_v9 = vld [vmem:[%s1931_s0 + $0x28] sm:$0xff]  ;;  %v924_v15 = vld [vmem:[%s1931_s0 + $0x30] sm:$0xff] }
   0x4   :  { %725 = vpow2.f32 %v696_v3  ;;  %v700_v10 = vmul.f32 -1.442695, %v909_v7  ;;  %v701_v12 = vmul.f32 -1.442695, %v915_v9  ;;  %v932_v18 = vld [vmem:[%s1931_s0 + $0x38] sm:$0xff]  ;;  %v939_v22 = vld [vmem:[%s1931_s0 + $0x40] sm:$0xff] }
   0x5   :  { %727 = vpow2.f32 %v697_v4  ;;  %v943_v24 = vmul.f32 -1.442695, %v924_v15  ;;  %v949_v28 = vmul.f32 -1.442695, %v932_v18  ;;  %v956_v33 = vmul.f32 -1.442695, %v939_v22 }
   0x6   :  { %729 = vpow2.f32 %v698_v6  ;;  %v958_v35 = vand.u32 127, %v33_v20 }
   0x7   :  { %731 = vtanh.f32 %v894_v2 }
   0x8   :  { %v722_v11 = vpop.eup %721  ;;  %733 = vpow2.f32 %v699_v8  ;;  %vm639_vm7 = vcmp.lt.s32.totalorder %v958_v35, 24 }
   0x9   :  { %v724_v13 = vpop.eup %723  ;;  %735 = vtanh.f32 %v902_v5  ;;  %v960_v36 = vmul.f32 1.5925153, %v722_v11 }
   0xa   :  { %v726_v14 = vpop.eup %725  ;;  %737 = vpow2.f32 %v700_v10  ;;  %v962_v37 = vmul.f32 1.5925153, %v724_v13 }
   0xb   :  { %v728_v16 = vpop.eup %727  ;;  %v926_v17 = vadd.f32 1.0, %v726_v14  ;;  %739 = vtanh.f32 %v909_v7 }
   0xc   :  { %v730_v19 = vpop.eup %729  ;;  %v934_v21 = vadd.f32 1.0, %v728_v16  ;;  %741 = vpow2.f32 %v701_v12 }
   0xd   :  { %v732_v23 = vpop.eup %731  ;;  %743 = vrcp.f32 %v926_v17  ;;  %v144_v26 = vand.u32 2147483647, %v926_v17  ;;  %v146_v27 = vand.u32 2147483648, %v926_v17  ;;  %v953_v32 = vadd.f32 1.0, %v730_v19 }
   0xe   :  { %v734_v25 = vpop.eup %733  ;;  %745 = vrcp.f32 %v934_v21  ;;  %v159_v30 = vand.u32 2147483647, %v934_v21  ;;  %v161_v31 = vand.u32 2147483648, %v934_v21  ;;  %vm140_vm0 = vweird.f32 %v926_v17 }
   0xf   :  { %v736_v29 = vpop.eup %735  ;;  %v964_v38 = vadd.f32 1.0, %v734_v25  ;;  %vm155_vm1 = vweird.f32 %v934_v21  ;;  %747 = vrcp.f32 %v953_v32  ;;  %v176_v40 = vand.u32 2147483648, %v953_v32 }
  0x10   :  { %v738_v34 = vpop.eup %737  ;;  %vm970_vm2 = vcmp.eq.f32.partialorder %v144_v26, 8.507059e+37  ;;  %v147_v43 = vor.u32 1.1754944e-38, %v146_v27  ;;  %v174_v44 = vand.u32 2147483647, %v953_v32  ;;  %v975_v45 = vmul.f32 1.5925153, %v732_v23 }
  0x11   :  { %v740_v39 = vpop.eup %739  ;;  %749 = vrcp.f32 %v964_v38  ;;  %vm978_vm3 = vcmp.eq.f32.partialorder %v159_v30, 8.507059e+37  ;;  %v162_v48 = vor.u32 1.1754944e-38, %v161_v31  ;;  %v189_v49 = vand.u32 2147483647, %v964_v38 }
  0x12   :  { %v742_v41 = vpop.eup %741  ;;  %v983_v50 = vmul.f32 1.5925153, %v736_v29  ;;  %v985_v51 = vadd.f32 1.0, %v738_v34  ;;  %vm170_vm4 = vweird.f32 %v953_v32  ;;  %vm185_vm5 = vweird.f32 %v964_v38 }
  0x13   :  { %v744_v46 = vpop.eup %743  ;;  %v191_v54 = vand.u32 2147483648, %v964_v38  ;;  %v994_v56 = vor.u32 1.1754944e-38, %v176_v40  ;;  %v997_v57 = vmul.f32 1.5925153, %v740_v39  ;;  %vm999_vm9 = vcmp.eq.f32.partialorder %v174_v44, 8.507059e+37 }
  0x14   :  { %v746_v52 = vpop.eup %745  ;;  %v136_v53 = vmul.f32 %v744_v46, %v926_v17  ;;  %751 = vrcp.f32 %v985_v51  ;;  %vm141_vm8 = vweird.f32 %v744_v46  ;;  %v204_v60 = vand.u32 2147483647, %v985_v51 }
  0x15   :  { %v151_v55 = vmul.f32 %v746_v52, %v934_v21  ;;  %v1004_v61 = vadd.f32 1.0, %v742_v41  ;;  %v748_v62 = vpop.eup %747  ;;  %vm156_vm11 = vweird.f32 %v746_v52  ;;  %vm1007_vm12 = vcmp.eq.f32.partialorder %v189_v49, 8.507059e+37  ;;  %vm1017_vm14 = vmor %vm140_vm0, %vm141_vm8 }
  0x16   :  { %v137_v58 = vsub.f32 1.0, %v136_v53  ;;  %v206_v4 = vand.u32 2147483648, %v985_v51  ;;  %v166_v10 = vmul.f32 %v748_v62, %v953_v32  ;;  %v192_v11 = vor.u32 1.1754944e-38, %v191_v54  ;;  %vm1026_vm6 = vmor %vm155_vm1, %vm156_vm11 }
  0x17   :  { %v152_v63 = vsub.f32 1.0, %v151_v55  ;;  %v750_v6 = vpop.eup %749  ;;  %vm200_vm13 = vweird.f32 %v985_v51  ;;  %vm171_vm10 = vweird.f32 %v748_v62  ;;  %753 = vtanh.f32 %v915_v9 }
  0x18   :  { %v138_v8 = vmul.f32 %v744_v46, %v137_v58  ;;  %v181_v14 = vmul.f32 %v750_v6, %v964_v38  ;;  %v167_v17 = vsub.f32 1.0, %v166_v10  ;;  %vm186_vm0 = vweird.f32 %v750_v6  ;;  %vm1047_vm11 = vmor %vm170_vm4, %vm171_vm10 }
  0x19   :  { %v153_v13 = vmul.f32 %v746_v52, %v152_v63  ;;  %vm1030_vm8 = vcmp.eq.f32.partialorder %v204_v60, 8.507059e+37  ;;  %755 = vrcp.f32 %v1004_v61  ;;  %v207_v27 = vor.u32 1.1754944e-38, %v206_v4 }
  0x1a   :  { %v139_v16 = vadd.f32 %v744_v46, %v138_v8  ;;  %v752_v23 = vpop.eup %751  ;;  %v182_v26 = vsub.f32 1.0, %v181_v14  ;;  %v219_v29 = vand.u32 2147483647, %v1004_v61  ;;  %v168_v30 = vmul.f32 %v748_v62, %v167_v17 }
  0x1b   :  { %v154_v25 = vadd.f32 %v746_v52, %v153_v13  ;;  %v196_v31 = vmul.f32 %v752_v23, %v985_v51  ;;  %vm215_vm1 = vweird.f32 %v1004_v61  ;;  %v221_v47 = vand.u32 2147483648, %v1004_v61 }
  0x1c   :  { %v143_v21 = vsel %vm1017_vm14, %v744_v46, %v139_v16  ;;  %v183_v41 = vmul.f32 %v750_v6, %v182_v26  ;;  %vm201_vm14 = vweird.f32 %v752_v23  ;;  %v169_v49 = vadd.f32 %v748_v62, %v168_v30 }
  0x1d   :  { %v148_v34 = vsel %vm970_vm2, %v147_v43, %v143_v21  ;;  %v158_v39 = vsel %vm1026_vm6, %v746_v52, %v154_v25  ;;  %vm1057_vm2 = vmor %vm185_vm5, %vm186_vm0  ;;  %v197_v32 = vsub.f32 1.0, %v196_v31  ;;  %v1061_v43 = vpop.eup %753  ;;  %vm1064_vm4 = vcmp.eq.f32.partialorder %v219_v29, 8.507059e+37 }
  0x1e   :  { %v510_v44 = vmul.f32 %v148_v34, %v884_v0  ;;  %v163_v46 = vsel %vm978_vm3, %v162_v48, %v158_v39  ;;  %v184_v53 = vadd.f32 %v750_v6, %v183_v41  ;;  %vm1953_vm3 = vcmp.ge.s32.totalorder %v958_v35, 16  ;;  %vm1088_vm6 = vmor %vm200_vm13, %vm201_vm14 }
  0x1f   :  { %v511_v52 = vmul.f32 %v163_v46, %v889_v1  ;;  %v756_v48 = vpop.eup %755  ;;  %vm1073_vm5 = vmand %vm1953_vm3, %vm639_vm7  ;;  %v173_v58 = vsel %vm1047_vm11, %v748_v62, %v169_v49  ;;  %v198_v60 = vmul.f32 %v752_v23, %v197_v32  ;;  %757 = vpow2.f32 %v943_v24  ;;  %v1198_v46 = vld [vmem:[%s1931_s0 + $0x68] sm:$0xff] }
  0x20   :  { %v535_v55 = vmul.f32 1.6772497, %v510_v44  ;;  %v178_v4 = vsel %vm999_vm9, %v994_v56, %v173_v58  ;;  %v188_v8 = vsel %vm1057_vm2, %v750_v6, %v184_v53  ;;  %v211_v62 = vmul.f32 %v756_v48, %v1004_v61  ;;  %v1149_v61 = vld [vmem:[%s1931_s0 + $0x50] sm:$0xff] }
  0x21   :  { %v536_v63 = vmul.f32 1.6772497, %v511_v52  ;;  %vm1958_vm7 = vcmp.lt.s32.totalorder %v958_v35, 16  ;;  %v512_v12 = vmul.f32 %v178_v4, %v894_v2  ;;  %v193_v56 = vsel %vm1007_vm12, %v192_v11, %v188_v8  ;;  %v1227_v8 = vld [vmem:[%s1931_s0 + $0x78] sm:$0xff] }
  0x22   :  { %v563_v24 = vsel %vm1958_vm7, %v535_v55, %v884_v0  ;;  %v199_v59 = vadd.f32 %v752_v23, %v198_v60  ;;  %vm1959_vm9 = vmmov %vm1958_vm7  ;;  %v513_v13 = vmul.f32 %v193_v56, %v902_v5  ;;  %v212_v14 = vsub.f32 1.0, %v211_v62  ;;  %v1217_v55 = vld [vmem:[%s1931_s0 + $0x70] sm:$0xff] }
  0x23   :  { %v641_v51 = vsel %vm1073_vm5, %v960_v36, %v563_v24  ;;  %v564_v6 = vsel %vm1959_vm9, %v536_v63, %v889_v1  ;;  %v537_v3 = vmul.f32 1.6772497, %v512_v12  ;;  %vm216_vm10 = vweird.f32 %v756_v48  ;;  %vm1960_vm12 = vmmov %vm1958_vm7 }
  0x24   :  { %667 = vst.msk [vmem:[%s1932_s1] sm:$0xff] %vm666_vm15, %v641_v51  ;;  %v642_v0 = vsel %vm1073_vm5, %v962_v37, %v564_v6  ;;  %v203_v36 = vsel %vm1088_vm6, %v752_v23, %v199_v59  ;;  %v538_v1 = vmul.f32 1.6772497, %v513_v13  ;;  %v213_v16 = vmul.f32 %v756_v48, %v212_v14  ;;  %v1125_v37 = vld [vmem:[%s1931_s0 + $0x48] sm:$0xff]  ;;  %vm1133_vm13 = vmor %vm215_vm1, %vm216_vm10 }
  0x25   :  { %668 = vst.msk [vmem:[%s1932_s1 + $0x8] sm:$0xff] %vm666_vm15, %v642_v0  ;;  %v208_v11 = vsel %vm1030_vm8, %v207_v27, %v203_v36  ;;  %759 = vtanh.f32 %v924_v15  ;;  %v758_v19 = vpop.eup %757  ;;  %v565_v17 = vsel %vm1960_vm12, %v537_v3, %v894_v2  ;;  %v222_v25 = vor.u32 1.1754944e-38, %v221_v47  ;;  %vm1963_vm0 = vmmov %vm1958_vm7 }
  0x26   :  { %v514_v23 = vmul.f32 %v208_v11, %v909_v7  ;;  %761 = vpow2.f32 %v949_v28  ;;  %v643_v26 = vsel %vm1073_vm5, %v975_v45, %v565_v17  ;;  %v566_v27 = vsel %vm1963_vm0, %v538_v1, %v902_v5  ;;  %vm1964_vm8 = vmmov %vm1963_vm0 }
  0x27   :  { %v214_v2 = vadd.f32 %v756_v48, %v213_v16  ;;  %v1144_v29 = vadd.f32 1.0, %v758_v19  ;;  %669 = vst.msk [vmem:[%s1932_s1 + $0x10] sm:$0xff] %vm666_vm15, %v643_v26  ;;  %v644_v28 = vsel %vm1073_vm5, %v983_v50, %v566_v27  ;;  %763 = vtanh.f32 %v932_v18  ;;  %vm1965_vm1 = vmmov %vm1963_vm0 }
  0x28   :  { %v539_v45 = vmul.f32 1.6772497, %v514_v23  ;;  %v705_v5 = vmul.f32 -1.442695, %v1125_v37  ;;  %670 = vst.msk [vmem:[%s1932_s1 + $0x18] sm:$0xff] %vm666_vm15, %v644_v28 }
  0x29   :  { %v218_v21 = vsel %vm1133_vm13, %v756_v48, %v214_v2  ;;  %765 = vrcp.f32 %v1144_v29  ;;  %v706_v31 = vmul.f32 -1.442695, %v1149_v61  ;;  %v234_v44 = vand.u32 2147483647, %v1144_v29 }
  0x2a   :  { %v567_v30 = vsel %vm1964_vm8, %v539_v45, %v909_v7  ;;  %v223_v50 = vsel %vm1064_vm4, %v222_v25, %v218_v21  ;;  %767 = vpow2.f32 %v956_v33  ;;  %v1182_v7 = vld [vmem:[%s1931_s0 + $0x58] sm:$0xff]  ;;  %v1187_v33 = vld [vmem:[%s1931_s0 + $0x60] sm:$0xff]  ;;  %v236_v42 = vand.u32 2147483648, %v1144_v29 }
  0x2b   :  { %v760_v34 = vpop.eup %759  ;;  %v645_v39 = vsel %vm1073_vm5, %v997_v57, %v567_v30  ;;  %v515_v40 = vmul.f32 %v223_v50, %v915_v9  ;;  %769 = vtanh.f32 %v939_v22  ;;  %v618_v57 = vmul.f32 1.5925153, %v1061_v43 }
  0x2c   :  { %v762_v41 = vpop.eup %761  ;;  %671 = vst.msk [vmem:[%s1932_s1 + $0x20] sm:$0xff] %vm666_vm15, %v645_v39  ;;  %771 = vpow2.f32 %v705_v5  ;;  %v707_v53 = vmul.f32 -1.442695, %v1182_v7  ;;  %v708_v43 = vmul.f32 -1.442695, %v1187_v33  ;;  %vm230_vm11 = vweird.f32 %v1144_v29 }
  0x2d   :  { %v540_v49 = vmul.f32 1.6772497, %v515_v40  ;;  %v1201_v32 = vadd.f32 1.0, %v762_v41  ;;  %773 = vtanh.f32 %v1125_v37  ;;  %v764_v52 = vpop.eup %763  ;;  %v1212_v48 = vmul.f32 -1.442695, %v1198_v46 }
  0x2e   :  { %775 = vpow2.f32 %v706_v31  ;;  %vm1233_vm14 = vcmp.eq.f32.partialorder %v234_v44, 8.507059e+37  ;;  %v237_v24 = vor.u32 1.1754944e-38, %v236_v42  ;;  %v1237_v12 = vmul.f32 1.5925153, %v760_v34 }
  0x2f   :  { %v766_v54 = vpop.eup %765  ;;  %v568_v47 = vsel %vm1965_vm1, %v540_v49, %v915_v9  ;;  %777 = vrcp.f32 %v1201_v32  ;;  %v249_v9 = vand.u32 2147483647, %v1201_v32  ;;  %v251_v4 = vand.u32 2147483648, %v1201_v32 }
  0x30   :  { %v768_v58 = vpop.eup %767  ;;  %v646_v60 = vsel %vm1073_vm5, %v618_v57, %v568_v47  ;;  %v226_v63 = vmul.f32 %v766_v54, %v1144_v29  ;;  %vm231_vm2 = vweird.f32 %v766_v54  ;;  %779 = vpow2.f32 %v707_v53 }
  0x31   :  { %v770_v10 = vpop.eup %769  ;;  %672 = vst.msk [vmem:[%s1932_s1 + $0x28] sm:$0xff] %vm666_vm15, %v646_v60  ;;  %v1239_v56 = vadd.f32 1.0, %v768_v58  ;;  %v1242_v6 = vmul.f32 -1.442695, %v1217_v55  ;;  %vm245_vm4 = vweird.f32 %v1201_v32  ;;  %v1245_v14 = vmul.f32 1.5925153, %v764_v52  ;;  %vm1261_vm6 = vmor %vm230_vm11, %vm231_vm2 }
  0x32   :  { %v772_v59 = vpop.eup %771  ;;  %v227_v51 = vsub.f32 1.0, %v226_v63  ;;  %v1249_v0 = vmul.f32 -1.442695, %v1227_v8  ;;  %vm1251_vm3 = vcmp.eq.f32.partialorder %v249_v9, 8.507059e+37  ;;  %v252_v11 = vor.u32 1.1754944e-38, %v251_v4 }
  0x33   :  { %v774_v13 = vpop.eup %773  ;;  %781 = vrcp.f32 %v1239_v56  ;;  %v1255_v16 = vadd.f32 1.0, %v772_v59  ;;  %v264_v23 = vand.u32 2147483647, %v1239_v56  ;;  %v266_v20 = vand.u32 2147483648, %v1239_v56 }
  0x34   :  { %v776_v3 = vpop.eup %775  ;;  %v228_v36 = vmul.f32 %v766_v54, %v227_v51  ;;  %783 = vtanh.f32 %v1149_v61  ;;  %v1271_v2 = vmul.f32 1.5925153, %v770_v10  ;;  %vm260_vm7 = vweird.f32 %v1239_v56 }
  0x35   :  { %v778_v19 = vpop.eup %777  ;;  %v1267_v25 = vadd.f32 1.0, %v776_v3  ;;  %785 = vtanh.f32 %v1182_v7  ;;  %v279_v29 = vand.u32 2147483647, %v1255_v16  ;;  %v1276_v28 = vmul.f32 1.5925153, %v774_v13 }
  0x36   :  { %v229_v26 = vadd.f32 %v766_v54, %v228_v36  ;;  %v241_v27 = vmul.f32 %v778_v19, %v1201_v32  ;;  %787 = vrcp.f32 %v1255_v16  ;;  %v780_v45 = vpop.eup %779  ;;  %vm246_vm9 = vweird.f32 %v778_v19 }
  0x37   :  { %789 = vrcp.f32 %v1267_v25  ;;  %vm1283_vm10 = vcmp.eq.f32.partialorder %v264_v23, 8.507059e+37  ;;  %v267_v34 = vor.u32 1.1754944e-38, %v266_v20  ;;  %v281_v39 = vand.u32 2147483648, %v1255_v16  ;;  %vm1297_vm13 = vmor %vm245_vm4, %vm246_vm9 }
  0x38   :  { %v233_v5 = vsel %vm1261_vm6, %v766_v54, %v229_v26  ;;  %v242_v21 = vsub.f32 1.0, %v241_v27  ;;  %791 = vpow2.f32 %v708_v43  ;;  %vm275_vm12 = vweird.f32 %v1255_v16 }
  0x39   :  { %v782_v30 = vpop.eup %781  ;;  %v238_v50 = vsel %vm1233_vm14, %v237_v24, %v233_v5  ;;  %vm1301_vm0 = vcmp.eq.f32.partialorder %v279_v29, 8.507059e+37  ;;  %vm290_vm8 = vweird.f32 %v1267_v25  ;;  %v294_v53 = vand.u32 2147483647, %v1267_v25 }
  0x3a   :  { %v1288_v40 = vpop.eup %783  ;;  %v516_v41 = vmul.f32 %v238_v50, %v924_v15  ;;  %v243_v57 = vmul.f32 %v778_v19, %v242_v21  ;;  %v256_v44 = vmul.f32 %v782_v30, %v1239_v56  ;;  %v1307_v43 = vadd.f32 1.0, %v780_v45 }
  0x3b   :  { %v1293_v49 = vpop.eup %785  ;;  %vm261_vm1 = vweird.f32 %v782_v30  ;;  %v282_v9 = vor.u32 1.1754944e-38, %v281_v39  ;;  %v296_v4 = vand.u32 2147483648, %v1267_v25  ;;  %vm1978_vm11 = vcmp.lt.s32.totalorder %v958_v35, 16 }
  0x3c   :  { %v788_v54 = vpop.eup %787  ;;  %v541_v47 = vmul.f32 1.6772497, %v516_v41  ;;  %v244_v58 = vadd.f32 %v778_v19, %v243_v57  ;;  %v257_v60 = vsub.f32 1.0, %v256_v44  ;;  %793 = vrcp.f32 %v1307_v43  ;;  %vm1325_vm14 = vmor %vm260_vm7, %vm261_vm1 }
  0x3d   :  { %v790_v32 = vpop.eup %789  ;;  %v271_v63 = vmul.f32 %v788_v54, %v1255_v16  ;;  %vm276_vm2 = vweird.f32 %v788_v54  ;;  %v297_v56 = vor.u32 1.1754944e-38, %v296_v4  ;;  %vm305_vm7 = vweird.f32 %v1307_v43 }
  0x3e   :  { %v792_v10 = vpop.eup %791  ;;  %v569_v62 = vsel %vm1978_vm11, %v541_v47, %v924_v15  ;;  %v248_v24 = vsel %vm1297_vm13, %v778_v19, %v244_v58  ;;  %v258_v59 = vmul.f32 %v782_v30, %v257_v60  ;;  %v286_v51 = vmul.f32 %v790_v32, %v1267_v25  ;;  %vm1344_vm6 = vmor %vm275_vm12, %vm276_vm2 }
  0x3f   :  { %v647_v13 = vsel %vm1073_vm5, %v1237_v12, %v569_v62  ;;  %v253_v3 = vsel %vm1251_vm3, %v252_v11, %v248_v24  ;;  %v272_v15 = vsub.f32 1.0, %v271_v63  ;;  %vm291_vm4 = vweird.f32 %v790_v32  ;;  %vm1987_vm12 = vmmov %vm1978_vm11 }
  0x40   :  { %673 = vst.msk [vmem:[%s1932_s1 + $0x30] sm:$0xff] %vm666_vm15, %v647_v13  ;;  %v517_v19 = vmul.f32 %v253_v3, %v932_v18  ;;  %v259_v17 = vadd.f32 %v782_v30, %v258_v59  ;;  %v287_v12 = vsub.f32 1.0, %v286_v51  ;;  %vm1334_vm3 = vcmp.eq.f32.partialorder %v294_v53, 8.507059e+37  ;;  %vm1353_vm9 = vmor %vm290_vm8, %vm291_vm4  ;;  %v1416_v51 = vld [vmem:[%s1931_s0 + $0x80] sm:$0xff] }
  0x41   :  { %v273_v1 = vmul.f32 %v788_v54, %v272_v15  ;;  %v1338_v23 = vadd.f32 1.0, %v792_v10  ;;  %v309_v16 = vand.u32 2147483647, %v1307_v43  ;;  %v311_v57 = vand.u32 2147483648, %v1307_v43  ;;  %vm1988_vm13 = vmmov %vm1978_vm11 }
  0x42   :  { %v542_v20 = vmul.f32 1.6772497, %v517_v19  ;;  %v263_v26 = vsel %vm1325_vm14, %v782_v30, %v259_v17  ;;  %v288_v29 = vmul.f32 %v790_v32, %v287_v12  ;;  %v794_v45 = vpop.eup %793  ;;  %v623_v47 = vmul.f32 1.5925153, %v1288_v40  ;;  %vm1993_vm2 = vmmov %vm1978_vm11  ;;  %v1445_v12 = vld [vmem:[%s1931_s0 + $0x88] sm:$0xff] }
  0x43   :  { %v268_v5 = vsel %vm1283_vm10, %v267_v34, %v263_v26  ;;  %v274_v21 = vadd.f32 %v788_v54, %v273_v1  ;;  %795 = vrcp.f32 %v1338_v23  ;;  %v301_v31 = vmul.f32 %v794_v45, %v1307_v43 }
  0x44   :  { %v570_v30 = vsel %vm1987_vm12, %v542_v20, %v932_v18  ;;  %v518_v39 = vmul.f32 %v268_v5, %v939_v22  ;;  %v289_v41 = vadd.f32 %v790_v32, %v288_v29  ;;  %vm306_vm10 = vweird.f32 %v794_v45  ;;  %v1478_v5 = vld [vmem:[%s1931_s0 + $0xa0] sm:$0xff] }
  0x45   :  { %v648_v25 = vsel %vm1073_vm5, %v1245_v14, %v570_v30  ;;  %v278_v34 = vsel %vm1344_vm6, %v788_v54, %v274_v21  ;;  %v302_v53 = vsub.f32 1.0, %v301_v31  ;;  %797 = vtanh.f32 %v1187_v33  ;;  %vm1397_vm8 = vmor %vm305_vm7, %vm306_vm10  ;;  %v1483_v21 = vld [vmem:[%s1931_s0 + $0xa8] sm:$0xff] }
  0x46   :  { %674 = vst.msk [vmem:[%s1932_s1 + $0x38] sm:$0xff] %vm666_vm15, %v648_v25  ;;  %v543_v18 = vmul.f32 1.6772497, %v518_v39  ;;  %v283_v44 = vsel %vm1301_vm0, %v282_v9, %v278_v34  ;;  %v293_v42 = vsel %vm1353_vm9, %v790_v32, %v289_v41  ;;  %vm1387_vm0 = vcmp.eq.f32.partialorder %v309_v16, 8.507059e+37  ;;  %vm1996_vm6 = vmmov %vm1993_vm2  ;;  %v1501_v34 = vld [vmem:[%s1931_s0 + $0xb0] sm:$0xff] }
  0x47   :  { %v519_v14 = vmul.f32 %v283_v44, %v1125_v37  ;;  %v298_v54 = vsel %vm1334_vm3, %v297_v56, %v293_v42  ;;  %v303_v60 = vmul.f32 %v794_v45, %v302_v53  ;;  %vm320_vm1 = vweird.f32 %v1338_v23  ;;  %vm1997_vm9 = vmmov %vm1993_vm2 }
  0x48   :  { %v571_v58 = vsel %vm1988_vm13, %v543_v18, %v939_v22  ;;  %v520_v52 = vmul.f32 %v298_v54, %v1149_v61  ;;  %v312_v22 = vor.u32 1.1754944e-38, %v311_v57  ;;  %v324_v24 = vand.u32 2147483647, %v1338_v23 }
  0x49   :  { %v796_v32 = vpop.eup %795  ;;  %v649_v9 = vsel %vm1073_vm5, %v1271_v2, %v571_v58  ;;  %v544_v4 = vmul.f32 1.6772497, %v519_v14  ;;  %v304_v62 = vadd.f32 %v794_v45, %v303_v60  ;;  %v326_v59 = vand.u32 2147483648, %v1338_v23 }
  0x4a   :  { %675 = vst.msk [vmem:[%s1932_s1 + $0x40] sm:$0xff] %vm666_vm15, %v649_v9  ;;  %v545_v10 = vmul.f32 1.6772497, %v520_v52  ;;  %v316_v2 = vmul.f32 %v796_v32, %v1338_v23  ;;  %vm321_vm14 = vweird.f32 %v796_v32  ;;  %799 = vpow2.f32 %v1212_v48  ;;  %v1466_v23 = vld [vmem:[%s1931_s0 + $0x98] sm:$0xff] }
  0x4b   :  { %v572_v43 = vsel %vm1978_vm11, %v544_v4, %v1125_v37  ;;  %v308_v37 = vsel %vm1397_vm8, %v794_v45, %v304_v62  ;;  %v798_v15 = vpop.eup %797  ;;  %801 = vtanh.f32 %v1198_v46  ;;  %v712_v17 = vmul.f32 -1.442695, %v1416_v51  ;;  %vm1451_vm4 = vmor %vm320_vm1, %vm321_vm14 }
  0x4c   :  { %v650_v13 = vsel %vm1073_vm5, %v1276_v28, %v572_v43  ;;  %v573_v3 = vsel %vm1993_vm2, %v545_v10, %v1149_v61  ;;  %v317_v36 = vsub.f32 1.0, %v316_v2  ;;  %v313_v28 = vsel %vm1387_vm0, %v312_v22, %v308_v37 }
  0x4d   :  { %676 = vst.msk [vmem:[%s1932_s1 + $0x48] sm:$0xff] %vm666_vm15, %v650_v13  ;;  %v651_v48 = vsel %vm1073_vm5, %v623_v47, %v573_v3  ;;  %v521_v61 = vmul.f32 %v313_v28, %v1182_v7  ;;  %803 = vpow2.f32 %v1242_v6  ;;  %v624_v1 = vmul.f32 1.5925153, %v1293_v49  ;;  %v1461_v49 = vld [vmem:[%s1931_s0 + $0x90] sm:$0xff] }
  0x4e   :  { %677 = vst.msk [vmem:[%s1932_s1 + $0x50] sm:$0xff] %vm666_vm15, %v651_v48  ;;  %v318_v19 = vmul.f32 %v796_v32, %v317_v36  ;;  %v327_v56 = vor.u32 1.1754944e-38, %v326_v59  ;;  %vm325_vm3 = vcmp.eq.f32.partialorder %v324_v24, 8.507059e+37  ;;  %805 = vpow2.f32 %v1249_v0 }
  0x4f   :  { %v546_v20 = vmul.f32 1.6772497, %v521_v61  ;;  %807 = vtanh.f32 %v1217_v55  ;;  %v713_v27 = vmul.f32 -1.442695, %v1445_v12  ;;  %v625_v30 = vmul.f32 1.5925153, %v798_v15 }
  0x50   :  { %v319_v26 = vadd.f32 %v796_v32, %v318_v19  ;;  %v800_v6 = vpop.eup %799  ;;  %809 = vpow2.f32 %v712_v17  ;;  %v714_v31 = vmul.f32 -1.442695, %v1461_v49  ;;  %v1496_v25 = vmul.f32 -1.442695, %v1466_v23 }
  0x51   :  { %v574_v29 = vsel %vm1996_vm6, %v546_v20, %v1182_v7  ;;  %v1473_v45 = vadd.f32 1.0, %v800_v6  ;;  %v802_v50 = vpop.eup %801  ;;  %811 = vtanh.f32 %v1227_v8  ;;  %v1506_v18 = vmul.f32 -1.442695, %v1478_v5 }
  0x52   :  { %v323_v0 = vsel %vm1451_vm4, %v796_v32, %v319_v26  ;;  %v652_v7 = vsel %vm1073_vm5, %v624_v1, %v574_v29  ;;  %v1509_v44 = vmul.f32 -1.442695, %v1483_v21  ;;  %v1515_v58 = vmul.f32 1.5925153, %v802_v50 }
  0x53   :  { %v328_v16 = vsel %vm325_vm3, %v327_v56, %v323_v0  ;;  %v804_v39 = vpop.eup %803  ;;  %678 = vst.msk [vmem:[%s1932_s1 + $0x58] sm:$0xff] %vm666_vm15, %v652_v7  ;;  %813 = vrcp.f32 %v1473_v45  ;;  %v339_v14 = vand.u32 2147483647, %v1473_v45  ;;  %v341_v54 = vand.u32 2147483648, %v1473_v45 }
  0x54   :  { %v522_v41 = vmul.f32 %v328_v16, %v1187_v33  ;;  %v1503_v57 = vadd.f32 1.0, %v804_v39  ;;  %815 = vpow2.f32 %v713_v27  ;;  %v806_v42 = vpop.eup %805  ;;  %vm335_vm7 = vweird.f32 %v1473_v45 }
  0x55   :  { %817 = vtanh.f32 %v1416_v51  ;;  %v808_v47 = vpop.eup %807  ;;  %v1519_v52 = vmul.f32 -1.442695, %v1501_v34  ;;  %v1525_v9 = vadd.f32 1.0, %v806_v42  ;;  %vm1537_vm12 = vcmp.eq.f32.partialorder %v339_v14, 8.507059e+37 }
  0x56   :  { %v547_v53 = vmul.f32 1.6772497, %v522_v41  ;;  %819 = vrcp.f32 %v1503_v57  ;;  %v810_v60 = vpop.eup %809  ;;  %v354_v32 = vand.u32 2147483647, %v1503_v57  ;;  %v356_v22 = vand.u32 2147483648, %v1503_v57 }
  0x57   :  { %821 = vtanh.f32 %v1445_v12  ;;  %v812_v4 = vpop.eup %811  ;;  %v1531_v10 = vadd.f32 1.0, %v810_v60  ;;  %v342_v2 = vor.u32 1.1754944e-38, %v341_v54  ;;  %v1541_v24 = vmul.f32 1.5925153, %v808_v47 }
  0x58   :  { %v575_v63 = vsel %vm1997_vm9, %v547_v53, %v1187_v33  ;;  %823 = vpow2.f32 %v714_v31  ;;  %v369_v13 = vand.u32 2147483647, %v1525_v9  ;;  %v371_v3 = vand.u32 2147483648, %v1525_v9 }
  0x59   :  { %v653_v40 = vsel %vm1073_vm5, %v625_v30, %v575_v63  ;;  %v814_v62 = vpop.eup %813  ;;  %825 = vrcp.f32 %v1525_v9  ;;  %vm350_vm10 = vweird.f32 %v1503_v57  ;;  %vm1549_vm13 = vcmp.eq.f32.partialorder %v354_v32, 8.507059e+37 }
  0x5a   :  { %679 = vst.msk [vmem:[%s1932_s1 + $0x60] sm:$0xff] %vm666_vm15, %v653_v40  ;;  %v816_v43 = vpop.eup %815  ;;  %v331_v59 = vmul.f32 %v814_v62, %v1473_v45  ;;  %827 = vrcp.f32 %v1531_v10  ;;  %v1553_v15 = vmul.f32 1.5925153, %v812_v4  ;;  %v384_v48 = vand.u32 2147483647, %v1531_v10 }
  0x5b   :  { %v818_v37 = vpop.eup %817  ;;  %vm336_vm0 = vweird.f32 %v814_v62  ;;  %v357_v19 = vor.u32 1.1754944e-38, %v356_v22  ;;  %v1556_v17 = vadd.f32 1.0, %v816_v43  ;;  %vm365_vm8 = vweird.f32 %v1525_v9 }
  0x5c   :  { %v820_v28 = vpop.eup %819  ;;  %v332_v61 = vsub.f32 1.0, %v331_v59  ;;  %vm380_vm1 = vweird.f32 %v1531_v10  ;;  %v386_v56 = vand.u32 2147483648, %v1531_v10  ;;  %vm1564_vm11 = vcmp.eq.f32.partialorder %v369_v13, 8.507059e+37  ;;  %vm1574_vm14 = vmor %vm335_vm7, %vm336_vm0 }
  0x5d   :  { %v1558_v1 = vpop.eup %821  ;;  %v346_v11 = vmul.f32 %v820_v28, %v1503_v57  ;;  %v372_v27 = vor.u32 1.1754944e-38, %v371_v3  ;;  %v1568_v29 = vmul.f32 1.5925153, %v818_v37  ;;  %829 = vrcp.f32 %v1556_v17 }
  0x5e   :  { %v824_v20 = vpop.eup %823  ;;  %v333_v26 = vmul.f32 %v814_v62, %v332_v61  ;;  %vm351_vm2 = vweird.f32 %v820_v28  ;;  %vm1578_vm4 = vcmp.eq.f32.partialorder %v384_v48, 8.507059e+37  ;;  %v399_v42 = vand.u32 2147483647, %v1556_v17 }
  0x5f   :  { %v826_v0 = vpop.eup %825  ;;  %v347_v7 = vsub.f32 1.0, %v346_v11  ;;  %v1582_v30 = vadd.f32 1.0, %v824_v20  ;;  %v401_v45 = vand.u32 2147483648, %v1556_v17  ;;  %v387_v54 = vor.u32 1.1754944e-38, %v386_v56  ;;  %vm1593_vm6 = vmor %vm350_vm10, %vm351_vm2 }
  0x60   :  { %v828_v39 = vpop.eup %827  ;;  %v334_v41 = vadd.f32 %v814_v62, %v333_v26  ;;  %v361_v31 = vmul.f32 %v826_v0, %v1525_v9  ;;  %vm395_vm3 = vweird.f32 %v1556_v17  ;;  %vm366_vm7 = vweird.f32 %v826_v0 }
  0x61   :  { %v348_v53 = vmul.f32 %v820_v28, %v347_v7  ;;  %v376_v14 = vmul.f32 %v828_v39, %v1531_v10  ;;  %831 = vrcp.f32 %v1582_v30  ;;  %vm381_vm9 = vweird.f32 %v828_v39  ;;  %vm1609_vm10 = vmor %vm365_vm8, %vm366_vm7 }
  0x62   :  { %v338_v47 = vsel %vm1574_vm14, %v814_v62, %v334_v41  ;;  %v362_v63 = vsub.f32 1.0, %v361_v31  ;;  %vm1601_vm0 = vcmp.eq.f32.partialorder %v399_v42, 8.507059e+37  ;;  %v402_v59 = vor.u32 1.1754944e-38, %v401_v45  ;;  %vm1619_vm14 = vmor %vm380_vm1, %vm381_vm9 }
  0x63   :  { %v343_v32 = vsel %vm1537_vm12, %v342_v2, %v338_v47  ;;  %v349_v4 = vadd.f32 %v820_v28, %v348_v53  ;;  %v377_v40 = vsub.f32 1.0, %v376_v14  ;;  %v830_v22 = vpop.eup %829  ;;  %vm410_vm12 = vweird.f32 %v1582_v30 }
  0x64   :  { %v523_v43 = vmul.f32 %v343_v32, %v1198_v46  ;;  %v363_v62 = vmul.f32 %v826_v0, %v362_v63  ;;  %v391_v3 = vmul.f32 %v830_v22, %v1556_v17  ;;  %v414_v9 = vand.u32 2147483647, %v1582_v30 }
  0x65   :  { %v353_v13 = vsel %vm1593_vm6, %v820_v28, %v349_v4  ;;  %v378_v2 = vmul.f32 %v828_v39, %v377_v40  ;;  %v416_v26 = vand.u32 2147483648, %v1582_v30  ;;  %vm2016_vm8 = vcmp.lt.s32.totalorder %v958_v35, 16 }
  0x66   :  { %v548_v37 = vmul.f32 1.6772497, %v523_v43  ;;  %v358_v48 = vsel %vm1549_vm13, %v357_v19, %v353_v13  ;;  %v364_v61 = vadd.f32 %v826_v0, %v363_v62  ;;  %v392_v20 = vsub.f32 1.0, %v391_v3  ;;  %vm2017_vm1 = vmmov %vm2016_vm8 }
  0x67   :  { %v524_v11 = vmul.f32 %v358_v48, %v1217_v55  ;;  %v379_v56 = vadd.f32 %v828_v39, %v378_v2  ;;  %v832_v50 = vpop.eup %831  ;;  %vm396_vm13 = vweird.f32 %v830_v22  ;;  %833 = vpow2.f32 %v1496_v25  ;;  %vm2023_vm6 = vmmov %vm2017_vm1  ;;  %v1729_v48 = vld [vmem:[%s1931_s0 + $0xc0] sm:$0xff] }
  0x68   :  { %v576_v36 = vsel %vm2016_vm8, %v548_v37, %v1198_v46  ;;  %v368_v10 = vsel %vm1609_vm10, %v826_v0, %v364_v61  ;;  %v393_v0 = vmul.f32 %v830_v22, %v392_v20  ;;  %vm411_vm2 = vweird.f32 %v832_v50  ;;  %vm2026_vm9 = vmmov %vm2017_vm1 }
  0x69   :  { %v654_v19 = vsel %vm1073_vm5, %v1515_v58, %v576_v36  ;;  %v549_v7 = vmul.f32 1.6772497, %v524_v11  ;;  %v373_v41 = vsel %vm1564_vm11, %v372_v27, %v368_v10  ;;  %v383_v31 = vsel %vm1619_vm14, %v828_v39, %v379_v56  ;;  %vm1653_vm11 = vmor %vm395_vm3, %vm396_vm13 }
  0x6a   :  { %680 = vst.msk [vmem:[%s1932_s1 + $0x68] sm:$0xff] %vm666_vm15, %v654_v19  ;;  %v525_v46 = vmul.f32 %v373_v41, %v1227_v8  ;;  %v388_v25 = vsel %vm1578_vm4, %v387_v54, %v383_v31  ;;  %v406_v58 = vmul.f32 %v832_v50, %v1582_v30  ;;  %835 = vtanh.f32 %v1461_v49  ;;  %vm2022_vm3 = vmmov %vm2017_vm1 }
  0x6b   :  { %v577_v6 = vsel %vm2017_vm1, %v549_v7, %v1217_v55  ;;  %v526_v27 = vmul.f32 %v388_v25, %v1416_v51  ;;  %v394_v45 = vadd.f32 %v830_v22, %v393_v0  ;;  %vm1665_vm4 = vcmp.eq.f32.partialorder %v414_v9, 8.507059e+37  ;;  %vm1686_vm7 = vmor %vm410_vm12, %vm411_vm2 }
  0x6c   :  { %v655_v16 = vsel %vm1073_vm5, %v1541_v24, %v577_v6  ;;  %v550_v42 = vmul.f32 1.6772497, %v525_v46  ;;  %v407_v53 = vsub.f32 1.0, %v406_v58  ;;  %v417_v14 = vor.u32 1.1754944e-38, %v416_v26 }
  0x6d   :  { %681 = vst.msk [vmem:[%s1932_s1 + $0x70] sm:$0xff] %vm666_vm15, %v655_v16  ;;  %v551_v55 = vmul.f32 1.6772497, %v526_v27  ;;  %v834_v54 = vpop.eup %833  ;;  %v398_v24 = vsel %vm1653_vm11, %v830_v22, %v394_v45  ;;  %837 = vpow2.f32 %v1506_v18  ;;  %v1693_v18 = vld [vmem:[%s1931_s0 + $0xb8] sm:$0xff]  ;;  %v630_v43 = vmul.f32 1.5925153, %v1558_v1 }
  0x6e   :  { %v578_v47 = vsel %vm2022_vm3, %v550_v42, %v1227_v8  ;;  %v408_v60 = vmul.f32 %v832_v50, %v407_v53  ;;  %v403_v4 = vsel %vm1601_vm0, %v402_v59, %v398_v24  ;;  %v129_v40 = vadd.f32 1.0, %v834_v54  ;;  %vm2027_vm0 = vmmov %vm2017_vm1 }
  0x6f   :  { %v656_v63 = vsel %vm1073_vm5, %v1553_v15, %v578_v47  ;;  %v579_v32 = vsel %vm2023_vm6, %v551_v55, %v1416_v51  ;;  %v527_v15 = vmul.f32 %v403_v4, %v1445_v12  ;;  %839 = vtanh.f32 %v1466_v23 }
  0x70   :  { %682 = vst.msk [vmem:[%s1932_s1 + $0x78] sm:$0xff] %vm666_vm15, %v656_v63  ;;  %v657_v51 = vsel %vm1073_vm5, %v1568_v29, %v579_v32  ;;  %v409_v30 = vadd.f32 %v832_v50, %v408_v60  ;;  %v836_v22 = vpop.eup %835  ;;  %841 = vrcp.f32 %v129_v40  ;;  %v719_v29 = vmul.f32 -1.442695, %v1693_v18 }
  0x71   :  { %683 = vst.msk [vmem:[%s1932_s1 + $0x80] sm:$0xff] %vm666_vm15, %v657_v51  ;;  %v552_v62 = vmul.f32 1.6772497, %v527_v15  ;;  %843 = vpow2.f32 %v1509_v44  ;;  %v631_v2 = vmul.f32 1.5925153, %v836_v22  ;;  %vm425_vm10 = vweird.f32 %v129_v40 }
  0x72   :  { %v413_v57 = vsel %vm1686_vm7, %v832_v50, %v409_v30  ;;  %845 = vtanh.f32 %v1478_v5  ;;  %v429_v3 = vand.u32 2147483647, %v129_v40  ;;  %v720_v20 = vmul.f32 -1.442695, %v1729_v48 }
  0x73   :  { %v418_v59 = vsel %vm1665_vm4, %v417_v14, %v413_v57  ;;  %v838_v13 = vpop.eup %837  ;;  %v580_v33 = vsel %vm2026_vm9, %v552_v62, %v1445_v12  ;;  %847 = vpow2.f32 %v1519_v52  ;;  %v431_v52 = vand.u32 2147483648, %v129_v40 }
  0x74   :  { %v528_v1 = vmul.f32 %v418_v59, %v1461_v49  ;;  %v658_v44 = vsel %vm1073_vm5, %v630_v43, %v580_v33  ;;  %v1723_v37 = vadd.f32 1.0, %v838_v13  ;;  %849 = vtanh.f32 %v1483_v21 }
  0x75   :  { %v840_v61 = vpop.eup %839  ;;  %684 = vst.msk [vmem:[%s1932_s1 + $0x88] sm:$0xff] %vm666_vm15, %v658_v44  ;;  %851 = vpow2.f32 %v719_v29  ;;  %vm1742_vm12 = vcmp.eq.f32.partialorder %v429_v3, 8.507059e+37  ;;  %v432_v7 = vor.u32 1.1754944e-38, %v431_v52 }
  0x76   :  { %v553_v12 = vmul.f32 1.6772497, %v528_v1  ;;  %v842_v28 = vpop.eup %841  ;;  %853 = vrcp.f32 %v1723_v37  ;;  %v1753_v31 = vmul.f32 1.5925153, %v840_v61  ;;  %v444_v46 = vand.u32 2147483647, %v1723_v37 }
  0x77   :  { %v844_v9 = vpop.eup %843  ;;  %v421_v56 = vmul.f32 %v842_v28, %v129_v40  ;;  %vm426_vm14 = vweird.f32 %v842_v28  ;;  %855 = vtanh.f32 %v1501_v34  ;;  %v446_v25 = vand.u32 2147483648, %v1723_v37 }
  0x78   :  { %v581_v11 = vsel %vm2027_vm0, %v553_v12, %v1461_v49  ;;  %v846_v26 = vpop.eup %845  ;;  %v1746_v10 = vadd.f32 1.0, %v844_v9  ;;  %vm440_vm8 = vweird.f32 %v1723_v37  ;;  %vm1762_vm13 = vmor %vm425_vm10, %vm426_vm14  ;;  %vm1775_vm1 = vcmp.eq.f32.partialorder %v444_v46, 8.507059e+37 }
  0x79   :  { %v659_v50 = vsel %vm1073_vm5, %v631_v2, %v581_v11  ;;  %v848_v19 = vpop.eup %847  ;;  %v422_v49 = vsub.f32 1.0, %v421_v56  ;;  %v1772_v17 = vmul.f32 1.5925153, %v846_v26  ;;  %v447_v54 = vor.u32 1.1754944e-38, %v446_v25 }
  0x7a   :  { %685 = vst.msk [vmem:[%s1932_s1 + $0x90] sm:$0xff] %vm666_vm15, %v659_v50  ;;  %v850_v41 = vpop.eup %849  ;;  %857 = vrcp.f32 %v1746_v10  ;;  %v1759_v6 = vadd.f32 1.0, %v848_v19  ;;  %v459_v16 = vand.u32 2147483647, %v1746_v10  ;;  %v461_v42 = vand.u32 2147483648, %v1746_v10 }
  0x7b   :  { %v852_v0 = vpop.eup %851  ;;  %v423_v58 = vmul.f32 %v842_v28, %v422_v49  ;;  %859 = vpow2.f32 %v720_v20  ;;  %v1779_v47 = vmul.f32 1.5925153, %v850_v41  ;;  %vm455_vm2 = vweird.f32 %v1746_v10 }
  0x7c   :  { %v854_v27 = vpop.eup %853  ;;  %v1768_v45 = vadd.f32 1.0, %v852_v0  ;;  %861 = vtanh.f32 %v1693_v18  ;;  %vm1789_vm4 = vcmp.eq.f32.partialorder %v459_v16, 8.507059e+37  ;;  %v462_v40 = vor.u32 1.1754944e-38, %v461_v42 }
  0x7d   :  { %v424_v53 = vadd.f32 %v842_v28, %v423_v58  ;;  %v436_v55 = vmul.f32 %v854_v27, %v1723_v37  ;;  %863 = vrcp.f32 %v1759_v6  ;;  %v1782_v24 = vpop.eup %855  ;;  %vm441_vm11 = vweird.f32 %v854_v27 }
  0x7e   :  { %865 = vrcp.f32 %v1768_v45  ;;  %vm470_vm3 = vweird.f32 %v1759_v6  ;;  %vm1801_vm6 = vmor %vm440_vm8, %vm441_vm11  ;;  %v474_v57 = vand.u32 2147483647, %v1759_v6  ;;  %v476_v29 = vand.u32 2147483648, %v1759_v6 }
  0x7f   :  { %v428_v60 = vsel %vm1762_vm13, %v842_v28, %v424_v53  ;;  %v437_v63 = vsub.f32 1.0, %v436_v55  ;;  %867 = vtanh.f32 %v1729_v48  ;;  %vm485_vm7 = vweird.f32 %v1768_v45 }
  0x80   :  { %v858_v32 = vpop.eup %857  ;;  %v433_v4 = vsel %vm1742_vm12, %v432_v7, %v428_v60  ;;  %v489_v37 = vand.u32 2147483647, %v1768_v45  ;;  %v491_v61 = vand.u32 2147483648, %v1768_v45  ;;  %vm1838_vm8 = vcmp.eq.f32.partialorder %v474_v57, 8.507059e+37 }
  0x81   :  { %v860_v51 = vpop.eup %859  ;;  %v529_v15 = vmul.f32 %v433_v4, %v1466_v23  ;;  %v438_v30 = vmul.f32 %v854_v27, %v437_v63  ;;  %v451_v22 = vmul.f32 %v858_v32, %v1746_v10  ;;  %vm456_vm9 = vweird.f32 %v858_v32 }
  0x82   :  { %v1797_v43 = vpop.eup %861  ;;  %v1808_v59 = vadd.f32 1.0, %v860_v51  ;;  %vm1829_vm10 = vmor %vm455_vm2, %vm456_vm9  ;;  %v477_v10 = vor.u32 1.1754944e-38, %v476_v29  ;;  %vm1842_vm13 = vcmp.eq.f32.partialorder %v489_v37, 8.507059e+37  ;;  %v492_v58 = vor.u32 1.1754944e-38, %v491_v61 }
  0x83   :  { %v864_v13 = vpop.eup %863  ;;  %v554_v33 = vmul.f32 1.6772497, %v529_v15  ;;  %v439_v1 = vadd.f32 %v854_v27, %v438_v30  ;;  %v452_v2 = vsub.f32 1.0, %v451_v22  ;;  %v635_v15 = vmul.f32 1.5925153, %v1782_v24 }
  0x84   :  { %v866_v44 = vpop.eup %865  ;;  %v466_v3 = vmul.f32 %v864_v13, %v1759_v6  ;;  %869 = vrcp.f32 %v1808_v59  ;;  %vm471_vm12 = vweird.f32 %v864_v13  ;;  %vm500_vm2 = vweird.f32 %v1808_v59 }
  0x85   :  { %v582_v12 = vsel %vm2027_vm0, %v554_v33, %v1466_v23  ;;  %v443_v52 = vsel %vm1801_vm6, %v854_v27, %v439_v1  ;;  %v453_v28 = vmul.f32 %v858_v32, %v452_v2  ;;  %v481_v9 = vmul.f32 %v866_v44, %v1768_v45  ;;  %v1820_v11 = vpop.eup %867  ;;  %vm2049_vm6 = vmmov %vm2027_vm0 }
  0x86   :  { %v660_v56 = vsel %vm1073_vm5, %v1753_v31, %v582_v12  ;;  %v448_v20 = vsel %vm1775_vm1, %v447_v54, %v443_v52  ;;  %v467_v23 = vsub.f32 1.0, %v466_v3  ;;  %vm486_vm14 = vweird.f32 %v866_v44  ;;  %vm1850_vm1 = vmor %vm470_vm3, %vm471_vm12 }
  0x87   :  { %686 = vst.msk [vmem:[%s1932_s1 + $0x98] sm:$0xff] %vm666_vm15, %v660_v56  ;;  %v530_v50 = vmul.f32 %v448_v20, %v1478_v5  ;;  %v454_v36 = vadd.f32 %v858_v32, %v453_v28  ;;  %v482_v19 = vsub.f32 1.0, %v481_v9  ;;  %vm1858_vm11 = vmor %vm485_vm7, %vm486_vm14  ;;  %v504_v6 = vand.u32 2147483647, %v1808_v59 }
  0x88   :  { %v468_v49 = vmul.f32 %v864_v13, %v467_v23  ;;  %vm2048_vm3 = vmmov %vm2027_vm0  ;;  %v506_v63 = vand.u32 2147483648, %v1808_v59  ;;  %v636_v29 = vmul.f32 1.5925153, %v1797_v43 }
  0x89   :  { %v555_v31 = vmul.f32 1.6772497, %v530_v50  ;;  %v458_v46 = vsel %vm1829_vm10, %v858_v32, %v454_v36  ;;  %v483_v0 = vmul.f32 %v866_v44, %v482_v19  ;;  %vm505_vm9 = vcmp.eq.f32.partialorder %v504_v6, 8.507059e+37  ;;  %vm2050_vm10 = vmmov %vm2027_vm0 }
  0x8a   :  { %v870_v27 = vpop.eup %869  ;;  %v463_v39 = vsel %vm1789_vm4, %v462_v40, %v458_v46  ;;  %v469_v16 = vadd.f32 %v864_v13, %v468_v49  ;;  %vm2051_vm12 = vmmov %vm2027_vm0 }
  0x8b   :  { %v583_v53 = vsel %vm2048_vm3, %v555_v31, %v1478_v5  ;;  %v531_v55 = vmul.f32 %v463_v39, %v1483_v21  ;;  %v484_v14 = vadd.f32 %v866_v44, %v483_v0  ;;  %v496_v54 = vmul.f32 %v870_v27, %v1808_v59 }
  0x8c   :  { %v661_v45 = vsel %vm1073_vm5, %v1772_v17, %v583_v53  ;;  %v473_v60 = vsel %vm1850_vm1, %v864_v13, %v469_v16  ;;  %vm501_vm4 = vweird.f32 %v870_v27  ;;  %v507_v13 = vor.u32 1.1754944e-38, %v506_v63 }
  0x8d   :  { %687 = vst.msk [vmem:[%s1932_s1 + $0xa0] sm:$0xff] %vm666_vm15, %v661_v45  ;;  %v556_v5 = vmul.f32 1.6772497, %v531_v55  ;;  %v478_v32 = vsel %vm1838_vm8, %v477_v10, %v473_v60  ;;  %v488_v4 = vsel %vm1858_vm11, %v866_v44, %v484_v14  ;;  %v497_v8 = vsub.f32 1.0, %v496_v54  ;;  %vm502_vm7 = vmor %vm500_vm2, %vm501_vm4 }
  0x8e   :  { %v532_v17 = vmul.f32 %v478_v32, %v1501_v34  ;;  %v493_v40 = vsel %vm1842_vm13, %v492_v58, %v488_v4  ;;  %v637_v44 = vmul.f32 1.5925153, %v1820_v11 }
  0x8f   :  { %v584_v51 = vsel %vm2049_vm6, %v556_v5, %v1483_v21  ;;  %v533_v30 = vmul.f32 %v493_v40, %v1693_v18  ;;  %v498_v22 = vmul.f32 %v870_v27, %v497_v8 }
  0x90   :  { %v662_v62 = vsel %vm1073_vm5, %v1779_v47, %v584_v51  ;;  %v557_v57 = vmul.f32 1.6772497, %v532_v17 }
  0x91   :  { %688 = vst.msk [vmem:[%s1932_s1 + $0xa8] sm:$0xff] %vm666_vm15, %v662_v62  ;;  %v558_v21 = vmul.f32 1.6772497, %v533_v30  ;;  %v499_v24 = vadd.f32 %v870_v27, %v498_v22 }
  0x92   :  { %v585_v47 = vsel %vm2027_vm0, %v557_v57, %v1501_v34 }
  0x93   :  { %v663_v43 = vsel %vm1073_vm5, %v635_v15, %v585_v47  ;;  %v586_v59 = vsel %vm2050_vm10, %v558_v21, %v1693_v18  ;;  %v503_v33 = vsel %vm502_vm7, %v870_v27, %v499_v24 }
  0x94   :  { %689 = vst.msk [vmem:[%s1932_s1 + $0xb0] sm:$0xff] %vm666_vm15, %v663_v43  ;;  %v664_v1 = vsel %vm1073_vm5, %v636_v29, %v586_v59  ;;  %v508_v2 = vsel %vm505_vm9, %v507_v13, %v503_v33 }
  0x95   :  { %690 = vst.msk [vmem:[%s1932_s1 + $0xb8] sm:$0xff] %vm666_vm15, %v664_v1  ;;  %v534_v34 = vmul.f32 %v508_v2, %v1729_v48 }
  0x97   :  { %v559_v18 = vmul.f32 1.6772497, %v534_v34 }
  0x99   :  { %v587_v3 = vsel %vm2051_vm12, %v559_v18, %v1729_v48 }
  0x9a   :  { %v665_v37 = vsel %vm1073_vm5, %v637_v44, %v587_v3 }
  0x9b   :  { %691 = vst.msk [vmem:[%s1932_s1 + $0xc0] sm:$0xff] %vm666_vm15, %v665_v37 }

</bundles_post_ra>
